<compile_context>
chip_gen: v5e
topology: v5e:2x2
jax: 0.10.0
libtpu: 0.0.40
codegen_flags: <defaults>
</compile_context>

<pallas_src>
import functools

import jax
import jax.numpy as jnp
import numpy as np
from jax.experimental import pallas as pl
from jax.experimental.pallas import tpu as pltpu

# ---- config (stand-in for default_args / obs_size / action_size) ----------
OBS_SIZE = 16
ACTION_SIZE = 4
HIDDEN = 32                # 4*HIDDEN == 128 -> gates pack into one lane block
NEG_SLOPE = 0.01           # nn.LeakyReLU default
LANE = 128

def _round8(n):
    return ((n + 7) // 8) * 8

OBS_PAD = _round8(OBS_SIZE)      # 16
ACT_PAD = _round8(ACTION_SIZE)   # 8


# ---------------------------- Pallas kernel --------------------------------
def critic_kernel(obs_ref, pa_ref, act_ref, h0_ref, c0_ref,
                  wih_obs_ref, wih_act_ref, whh_ref, b_ref,
                  w1h_ref, w1a_ref, b1_ref, w2_ref, b2_ref,
                  q_ref, hn_ref, cn_ref, hseq_ref, *, T):
    Bp = h0_ref.shape[0]          # sublane-padded batch
    H = h0_ref.shape[1]           # 32 (exact hidden size, no lane padding)

    # Input->gate projections for ALL timesteps in one MXU pass.
    # Packed layout: columns = [i | f | g | o], each H=32 lanes wide (4H = 128).
    xg_all = (jnp.dot(obs_ref[...], wih_obs_ref[...],
                      preferred_element_type=jnp.float32)
              + jnp.dot(pa_ref[...], wih_act_ref[...],
                        preferred_element_type=jnp.float32)
              + b_ref[...])                                    # (T*Bp, 4H) f32

    whh = whh_ref[...]                                         # (H, 4H) bf16
    h = h0_ref[...]                                            # (Bp, H) f32
    c = c0_ref[...]
    # T is small & static -> fully unrolled; h/c stay in vregs across steps.
    for t in range(T):
        gates = xg_all[t * Bp:(t + 1) * Bp, :] + jnp.dot(
            h.astype(whh.dtype), whh,
            preferred_element_type=jnp.float32)                # (Bp, 4H), 1 MXU pass
        # Two full-vreg EUP passes over the packed gates, then 32-lane sub-blocks
        # (lane extraction handled by Mosaic on the XLU slot).
        sig = jax.nn.sigmoid(gates)
        tnh = jnp.tanh(gates)
        i_g = sig[:, 0 * H:1 * H]
        f_g = sig[:, 1 * H:2 * H]
        g_g = tnh[:, 2 * H:3 * H]
        o_g = sig[:, 3 * H:4 * H]
        c = f_g * c + i_g * g_g                                # f32 cell math
        h = o_g * jnp.tanh(c)
        hseq_ref[t * Bp:(t + 1) * Bp, :] = h                   # stream to scratch

    hn_ref[...] = h
    cn_ref[...] = c

    # Head for all timesteps at once: Linear(H+A->H) as two dots (no concat),
    # LeakyReLU, Linear(H->1) via a lane-padded w2 (useful result in column 0).
    hseq = hseq_ref[...]                                       # (T*Bp, H) f32
    y1 = (jnp.dot(hseq.astype(w1h_ref.dtype), w1h_ref[...],
                  preferred_element_type=jnp.float32)
          + jnp.dot(act_ref[...], w1a_ref[...],
                    preferred_element_type=jnp.float32)
          + b1_ref[...])
    y1 = jnp.maximum(y1, NEG_SLOPE * y1)                       # LeakyReLU, 1 VPU op
    q = jnp.dot(y1.astype(w2_ref.dtype), w2_ref[...],
                preferred_element_type=jnp.float32) + b2_ref[...]
    q_ref[...] = q                                             # one lane-dense store


# ------------------------ one-time weight packing ----------------------------
def prepare_params(params):
    """Pack/transpose weights once (off the per-call hot path). Matmul operands
    are stored in bf16; biases stay f32 (added after f32 accumulation)."""
    H = HIDDEN
    cdt = jnp.bfloat16
    w_ih = params["w_ih"]                       # (4H, OBS+ACT), gate order i,f,g,o
    w_hh = params["w_hh"]                       # (4H, H)

    def pad_rows(w, rows):                      # zero-pad contracted dim to sublane mult.
        return jnp.pad(w, ((0, rows - w.shape[0]), (0, 0)))

    wih_obs = pad_rows(w_ih[:, :OBS_SIZE].T, OBS_PAD).astype(cdt)      # (OBS_PAD, 4H)
    wih_act = pad_rows(w_ih[:, OBS_SIZE:].T, ACT_PAD).astype(cdt)      # (ACT_PAD, 4H)
    whh_p = w_hh.T.astype(cdt)                                         # (H, 4H)
    b_p = (params["b_ih"] + params["b_hh"]).astype(jnp.float32).reshape(1, 4 * H)

    w1 = params["w1"]                                                  # (H, H+A)
    w1h_p = w1[:, :H].T.astype(cdt)                                    # (H, H)
    w1a_p = pad_rows(w1[:, H:].T, ACT_PAD).astype(cdt)                 # (ACT_PAD, H)
    b1_p = params["b1"].astype(jnp.float32).reshape(1, H)
    w2_p = jnp.zeros((H, LANE), cdt).at[:, 0].set(params["w2"][0].astype(cdt))
    b2_p = jnp.zeros((1, LANE), jnp.float32).at[0, 0].set(params["b2"][0])

    return {"wih_obs": wih_obs, "wih_act": wih_act, "whh": whh_p, "b": b_p,
            "w1h": w1h_p, "w1a": w1a_p, "b1": b1_p, "w2": w2_p, "b2": b2_p}


# ------------------------------ wrapper -------------------------------------
def critic_forward(obs, prev_action, action, prep, hidden=None):
    """obs: (B,T,obs), prev_action/action: (B,T,act). Returns (q (B,T,1), (h_n, c_n))."""
    B, T, _ = obs.shape
    H = HIDDEN
    Bp = max(8, _round8(B))                      # sublane-pad the batch

    def to_tmajor(x, feat_pad):                  # (B,T,F) -> (T*Bp, feat_pad) bf16
        F = x.shape[-1]
        x = jnp.transpose(x.astype(jnp.bfloat16), (1, 0, 2))
        x = jnp.pad(x, ((0, 0), (0, Bp - B), (0, feat_pad - F)))
        return x.reshape(T * Bp, feat_pad)

    obs_f = to_tmajor(obs, OBS_PAD)
    pa_f = to_tmajor(prev_action, ACT_PAD)
    act_f = to_tmajor(action, ACT_PAD)

    if hidden is None:
        h0 = jnp.zeros((Bp, H), jnp.float32)
        c0 = jnp.zeros((Bp, H), jnp.float32)
    else:
        h0 = jnp.zeros((Bp, H), jnp.float32).at[:B].set(
            hidden[0].reshape(B, H).astype(jnp.float32))
        c0 = jnp.zeros((Bp, H), jnp.float32).at[:B].set(
            hidden[1].reshape(B, H).astype(jnp.float32))

    vmem = pl.BlockSpec(memory_space=pltpu.MemorySpace.VMEM)   # whole-array, VMEM-resident
    out_shapes = (
        jax.ShapeDtypeStruct((T * Bp, LANE), jnp.float32),     # q slab (column 0 used)
        jax.ShapeDtypeStruct((Bp, H), jnp.float32),            # h_n (batch-padded)
        jax.ShapeDtypeStruct((Bp, H), jnp.float32),            # c_n (batch-padded)
    )

    q_p, hn_p, cn_p = pl.pallas_call(
        functools.partial(critic_kernel, T=T),
        out_shape=out_shapes,
        in_specs=[vmem] * 14,
        out_specs=(vmem, vmem, vmem),
        scratch_shapes=[pltpu.VMEM((T * Bp, H), jnp.float32)],  # streamed h sequence
    )(obs_f, pa_f, act_f, h0, c0,
      prep["wih_obs"], prep["wih_act"], prep["whh"], prep["b"],
      prep["w1h"], prep["w1a"], prep["b1"], prep["w2"], prep["b2"])

    q = q_p[:, 0].reshape(T, Bp)[:, :B].T[..., None]           # (B, T, 1)
    hn = hn_p[:B]
    cn = cn_p[:B]
    # TODO(synk): PyTorch's `.to('cpu')` at the end of forward is a host transfer,
    # not a kernel op; callers can jax.device_get the result if needed.
    return q, (hn[None], cn[None])                             # hidden like PyTorch (1,B,H)


# --------------------------- pure-JAX reference ------------------------------
def ref_forward(obs, prev_action, action, params):
    x = jnp.concatenate([obs, prev_action], -1).astype(jnp.float32)
    B, T, _ = x.shape
    H = HIDDEN

    def step(carry, x_t):
        h, c = carry
        gates = (x_t @ params["w_ih"].T + h @ params["w_hh"].T
                 + params["b_ih"] + params["b_hh"])
        i = jax.nn.sigmoid(gates[:, :H])
        f = jax.nn.sigmoid(gates[:, H:2 * H])
        g = jnp.tanh(gates[:, 2 * H:3 * H])
        o = jax.nn.sigmoid(gates[:, 3 * H:])
        c = f * c + i * g
        h = o * jnp.tanh(c)
        return (h, c), h

    (hn, cn), hseq = jax.lax.scan(
        step, (jnp.zeros((B, H), jnp.float32), jnp.zeros((B, H), jnp.float32)),
        jnp.transpose(x, (1, 0, 2)))
    hseq = jnp.transpose(hseq, (1, 0, 2))
    z = jnp.concatenate([hseq, action.astype(jnp.float32)], -1)
    y1 = z @ params["w1"].T + params["b1"]
    y1 = jnp.where(y1 >= 0, y1, NEG_SLOPE * y1)
    q = y1 @ params["w2"].T + params["b2"]
    return q, (hn[None], cn[None])


# ------------------------------ params ---------------------------------------
def init_params(key):
    H, A, O = HIDDEN, ACTION_SIZE, OBS_SIZE
    in_size = O + A
    k_lstm = 1.0 / np.sqrt(H)
    k1 = 1.0 / np.sqrt(H + A)
    k2 = 1.0 / np.sqrt(H)
    ks = jax.random.split(key, 8)
    u = lambda k, shape, bound: jax.random.uniform(
        k, shape, jnp.float32, -bound, bound)
    return {
        "w_ih": u(ks[0], (4 * H, in_size), k_lstm),
        "w_hh": u(ks[1], (4 * H, H), k_lstm),
        "b_ih": u(ks[2], (4 * H,), k_lstm),
        "b_hh": u(ks[3], (4 * H,), k_lstm),
        "w1":   u(ks[4], (H, H + A), k1),
        "b1":   u(ks[5], (H,), k1),
        "w2":   u(ks[6], (1, H), k2),
        "b2":   u(ks[7], (1,), k2),
    }


# -------------------------------- main ----------------------------------------
if __name__ == "__main__":
    B, T = 2, 8
    key = jax.random.PRNGKey(0)
    k_obs, k_pa, k_a, k_p = jax.random.split(key, 4)

    obs = jax.random.normal(k_obs, (B, T, OBS_SIZE), jnp.float32)
    prev_action = jax.random.normal(k_pa, (B, T, ACTION_SIZE), jnp.float32)
    action = jax.random.normal(k_a, (B, T, ACTION_SIZE), jnp.float32)
    params = init_params(k_p)
    prep = prepare_params(params)            # one-time weight packing (off hot path)

    q, (hn, cn) = critic_forward(obs, prev_action, action, prep, hidden=None)
    jax.block_until_ready((q, hn, cn))

    q_ref, (hn_ref, cn_ref) = ref_forward(obs, prev_action, action, params)
    # bf16 matmul operands (f32 accumulate / f32 state math) -> relaxed tolerance.
    np.testing.assert_allclose(np.asarray(q), np.asarray(q_ref), rtol=2e-2, atol=2e-2)
    np.testing.assert_allclose(np.asarray(hn), np.asarray(hn_ref), rtol=2e-2, atol=2e-2)
    np.testing.assert_allclose(np.asarray(cn), np.asarray(cn_ref), rtol=2e-2, atol=2e-2)

    print("KERNEL_OK")
</pallas_src>

<mosaic_0001>
module attributes {stable_mosaic.version = 11 : i64} {
  func.func @critic_kernel(%arg0: memref<64x16xbf16, #tpu.memory_space<vmem>>, %arg1: memref<64x8xbf16, #tpu.memory_space<vmem>>, %arg2: memref<64x8xbf16, #tpu.memory_space<vmem>>, %arg3: memref<8x32xf32, #tpu.memory_space<vmem>>, %arg4: memref<8x32xf32, #tpu.memory_space<vmem>>, %arg5: memref<16x128xbf16, #tpu.memory_space<vmem>>, %arg6: memref<8x128xbf16, #tpu.memory_space<vmem>>, %arg7: memref<32x128xbf16, #tpu.memory_space<vmem>>, %arg8: memref<1x128xf32, #tpu.memory_space<vmem>>, %arg9: memref<32x32xbf16, #tpu.memory_space<vmem>>, %arg10: memref<8x32xbf16, #tpu.memory_space<vmem>>, %arg11: memref<1x32xf32, #tpu.memory_space<vmem>>, %arg12: memref<32x128xbf16, #tpu.memory_space<vmem>>, %arg13: memref<1x128xf32, #tpu.memory_space<vmem>>, %arg14: memref<64x128xf32, #tpu.memory_space<vmem>>, %arg15: memref<8x32xf32, #tpu.memory_space<vmem>>, %arg16: memref<8x32xf32, #tpu.memory_space<vmem>>, %arg17: memref<64x32xf32, #tpu.memory_space<vmem>>) attributes {dimension_semantics = [], scalar_prefetch = 0 : i64, scratch_operands = 1 : i64, tpu.core_type = #tpu.core_type<tc>} {
    %c0 = arith.constant 0 : index
    %c0_0 = arith.constant 0 : index
    %0 = vector.load %arg0[%c0, %c0_0] : memref<64x16xbf16, #tpu.memory_space<vmem>>, vector<64x16xbf16>
    %c0_1 = arith.constant 0 : index
    %c0_2 = arith.constant 0 : index
    %1 = vector.load %arg5[%c0_1, %c0_2] : memref<16x128xbf16, #tpu.memory_space<vmem>>, vector<16x128xbf16>
    %cst = arith.constant dense<0.000000e+00> : vector<64x128xf32>
    %2 = tpu.matmul %0, %1, %cst {dimension_numbers = #tpu.dot_dimension_numbers<[1], [0], [0], [1], [0, 0, 1, 1], [], []>} : vector<64x16xbf16>, vector<16x128xbf16>, vector<64x128xf32> -> vector<64x128xf32>
    %c0_3 = arith.constant 0 : index
    %c0_4 = arith.constant 0 : index
    %3 = vector.load %arg1[%c0_3, %c0_4] : memref<64x8xbf16, #tpu.memory_space<vmem>>, vector<64x8xbf16>
    %c0_5 = arith.constant 0 : index
    %c0_6 = arith.constant 0 : index
    %4 = vector.load %arg6[%c0_5, %c0_6] : memref<8x128xbf16, #tpu.memory_space<vmem>>, vector<8x128xbf16>
    %cst_7 = arith.constant dense<0.000000e+00> : vector<64x128xf32>
    %5 = tpu.matmul %3, %4, %cst_7 {dimension_numbers = #tpu.dot_dimension_numbers<[1], [0], [0], [1], [0, 0, 1, 1], [], []>} : vector<64x8xbf16>, vector<8x128xbf16>, vector<64x128xf32> -> vector<64x128xf32>
    %6 = arith.addf %2, %5 : vector<64x128xf32>
    %c0_8 = arith.constant 0 : index
    %c0_9 = arith.constant 0 : index
    %7 = vector.load %arg8[%c0_8, %c0_9] : memref<1x128xf32, #tpu.memory_space<vmem>>, vector<1x128xf32>
    %8 = vector.broadcast %7 : vector<1x128xf32> to vector<64x128xf32>
    %9 = arith.addf %6, %8 : vector<64x128xf32>
    %c0_10 = arith.constant 0 : index
    %c0_11 = arith.constant 0 : index
    %10 = vector.load %arg7[%c0_10, %c0_11] : memref<32x128xbf16, #tpu.memory_space<vmem>>, vector<32x128xbf16>
    %c0_12 = arith.constant 0 : index
    %c0_13 = arith.constant 0 : index
    %11 = vector.load %arg3[%c0_12, %c0_13] : memref<8x32xf32, #tpu.memory_space<vmem>>, vector<8x32xf32>
    %c0_14 = arith.constant 0 : index
    %c0_15 = arith.constant 0 : index
    %12 = vector.load %arg4[%c0_14, %c0_15] : memref<8x32xf32, #tpu.memory_space<vmem>>, vector<8x32xf32>
    %13 = vector.extract_strided_slice %9 {offsets = [0, 0], sizes = [8, 128], strides = [1, 1]} : vector<64x128xf32> to vector<8x128xf32>
    %14 = arith.truncf %11 : vector<8x32xf32> to vector<8x32xbf16>
    %cst_16 = arith.constant dense<0.000000e+00> : vector<8x128xf32>
    %15 = tpu.matmul %14, %10, %cst_16 {dimension_numbers = #tpu.dot_dimension_numbers<[1], [0], [0], [1], [0, 0, 1, 1], [], []>} : vector<8x32xbf16>, vector<32x128xbf16>, vector<8x128xf32> -> vector<8x128xf32>
    %16 = arith.addf %13, %15 : vector<8x128xf32>
    %17 = arith.negf %16 : vector<8x128xf32>
    %18 = math.exp %17 : vector<8x128xf32>
    %cst_17 = arith.constant 1.000000e+00 : f32
    %19 = vector.broadcast %cst_17 : f32 to vector<8x128xf32>
    %20 = arith.addf %19, %18 : vector<8x128xf32>
    %21 = arith.divf %19, %20 : vector<8x128xf32>
    %22 = math.tanh %16 : vector<8x128xf32>
    %23 = vector.extract_strided_slice %21 {offsets = [0, 0], sizes = [8, 32], strides = [1, 1]} : vector<8x128xf32> to vector<8x32xf32>
    %24 = vector.extract_strided_slice %21 {offsets = [0, 32], sizes = [8, 32], strides = [1, 1]} : vector<8x128xf32> to vector<8x32xf32>
    %25 = vector.extract_strided_slice %22 {offsets = [0, 64], sizes = [8, 32], strides = [1, 1]} : vector<8x128xf32> to vector<8x32xf32>
    %26 = vector.extract_strided_slice %21 {offsets = [0, 96], sizes = [8, 32], strides = [1, 1]} : vector<8x128xf32> to vector<8x32xf32>
    %27 = arith.mulf %24, %12 : vector<8x32xf32>
    %28 = arith.mulf %23, %25 : vector<8x32xf32>
    %29 = arith.addf %27, %28 : vector<8x32xf32>
    %30 = math.tanh %29 : vector<8x32xf32>
    %31 = arith.mulf %26, %30 : vector<8x32xf32>
    %c0_18 = arith.constant 0 : index
    %c0_19 = arith.constant 0 : index
    %32 = vector.load %arg17[%c0_18, %c0_19] : memref<64x32xf32, #tpu.memory_space<vmem>>, vector<8x32xf32>
    tpu.vector_store %arg17[%c0_18, %c0_19], %31 {strides = array<i32>} : memref<64x32xf32, #tpu.memory_space<vmem>>, vector<8x32xf32>,
    %33 = vector.extract_strided_slice %9 {offsets = [8, 0], sizes = [8, 128], strides = [1, 1]} : vector<64x128xf32> to vector<8x128xf32>
    %34 = arith.truncf %31 : vector<8x32xf32> to vector<8x32xbf16>
    %cst_20 = arith.constant dense<0.000000e+00> : vector<8x128xf32>
    %35 = tpu.matmul %34, %10, %cst_20 {dimension_numbers = #tpu.dot_dimension_numbers<[1], [0], [0], [1], [0, 0, 1, 1], [], []>} : vector<8x32xbf16>, vector<32x128xbf16>, vector<8x128xf32> -> vector<8x128xf32>
    %36 = arith.addf %33, %35 : vector<8x128xf32>
    %37 = arith.negf %36 : vector<8x128xf32>
    %38 = math.exp %37 : vector<8x128xf32>
    %cst_21 = arith.constant 1.000000e+00 : f32
    %39 = vector.broadcast %cst_21 : f32 to vector<8x128xf32>
    %40 = arith.addf %39, %38 : vector<8x128xf32>
    %41 = arith.divf %39, %40 : vector<8x128xf32>
    %42 = math.tanh %36 : vector<8x128xf32>
    %43 = vector.extract_strided_slice %41 {offsets = [0, 0], sizes = [8, 32], strides = [1, 1]} : vector<8x128xf32> to vector<8x32xf32>
    %44 = vector.extract_strided_slice %41 {offsets = [0, 32], sizes = [8, 32], strides = [1, 1]} : vector<8x128xf32> to vector<8x32xf32>
    %45 = vector.extract_strided_slice %42 {offsets = [0, 64], sizes = [8, 32], strides = [1, 1]} : vector<8x128xf32> to vector<8x32xf32>
    %46 = vector.extract_strided_slice %41 {offsets = [0, 96], sizes = [8, 32], strides = [1, 1]} : vector<8x128xf32> to vector<8x32xf32>
    %47 = arith.mulf %44, %29 : vector<8x32xf32>
    %48 = arith.mulf %43, %45 : vector<8x32xf32>
    %49 = arith.addf %47, %48 : vector<8x32xf32>
    %50 = math.tanh %49 : vector<8x32xf32>
    %51 = arith.mulf %46, %50 : vector<8x32xf32>
    %c8 = arith.constant 8 : index
    %c0_22 = arith.constant 0 : index
    %52 = vector.load %arg17[%c8, %c0_22] : memref<64x32xf32, #tpu.memory_space<vmem>>, vector<8x32xf32>
    tpu.vector_store %arg17[%c8, %c0_22], %51 {strides = array<i32>} : memref<64x32xf32, #tpu.memory_space<vmem>>, vector<8x32xf32>,
    %53 = vector.extract_strided_slice %9 {offsets = [16, 0], sizes = [8, 128], strides = [1, 1]} : vector<64x128xf32> to vector<8x128xf32>
    %54 = arith.truncf %51 : vector<8x32xf32> to vector<8x32xbf16>
    %cst_23 = arith.constant dense<0.000000e+00> : vector<8x128xf32>
    %55 = tpu.matmul %54, %10, %cst_23 {dimension_numbers = #tpu.dot_dimension_numbers<[1], [0], [0], [1], [0, 0, 1, 1], [], []>} : vector<8x32xbf16>, vector<32x128xbf16>, vector<8x128xf32> -> vector<8x128xf32>
    %56 = arith.addf %53, %55 : vector<8x128xf32>
    %57 = arith.negf %56 : vector<8x128xf32>
    %58 = math.exp %57 : vector<8x128xf32>
    %cst_24 = arith.constant 1.000000e+00 : f32
    %59 = vector.broadcast %cst_24 : f32 to vector<8x128xf32>
    %60 = arith.addf %59, %58 : vector<8x128xf32>
    %61 = arith.divf %59, %60 : vector<8x128xf32>
    %62 = math.tanh %56 : vector<8x128xf32>
    %63 = vector.extract_strided_slice %61 {offsets = [0, 0], sizes = [8, 32], strides = [1, 1]} : vector<8x128xf32> to vector<8x32xf32>
    %64 = vector.extract_strided_slice %61 {offsets = [0, 32], sizes = [8, 32], strides = [1, 1]} : vector<8x128xf32> to vector<8x32xf32>
    %65 = vector.extract_strided_slice %62 {offsets = [0, 64], sizes = [8, 32], strides = [1, 1]} : vector<8x128xf32> to vector<8x32xf32>
    %66 = vector.extract_strided_slice %61 {offsets = [0, 96], sizes = [8, 32], strides = [1, 1]} : vector<8x128xf32> to vector<8x32xf32>
    %67 = arith.mulf %64, %49 : vector<8x32xf32>
    %68 = arith.mulf %63, %65 : vector<8x32xf32>
    %69 = arith.addf %67, %68 : vector<8x32xf32>
    %70 = math.tanh %69 : vector<8x32xf32>
    %71 = arith.mulf %66, %70 : vector<8x32xf32>
    %c16 = arith.constant 16 : index
    %c0_25 = arith.constant 0 : index
    %72 = vector.load %arg17[%c16, %c0_25] : memref<64x32xf32, #tpu.memory_space<vmem>>, vector<8x32xf32>
    tpu.vector_store %arg17[%c16, %c0_25], %71 {strides = array<i32>} : memref<64x32xf32, #tpu.memory_space<vmem>>, vector<8x32xf32>,
    %73 = vector.extract_strided_slice %9 {offsets = [24, 0], sizes = [8, 128], strides = [1, 1]} : vector<64x128xf32> to vector<8x128xf32>
    %74 = arith.truncf %71 : vector<8x32xf32> to vector<8x32xbf16>
    %cst_26 = arith.constant dense<0.000000e+00> : vector<8x128xf32>
    %75 = tpu.matmul %74, %10, %cst_26 {dimension_numbers = #tpu.dot_dimension_numbers<[1], [0], [0], [1], [0, 0, 1, 1], [], []>} : vector<8x32xbf16>, vector<32x128xbf16>, vector<8x128xf32> -> vector<8x128xf32>
    %76 = arith.addf %73, %75 : vector<8x128xf32>
    %77 = arith.negf %76 : vector<8x128xf32>
    %78 = math.exp %77 : vector<8x128xf32>
    %cst_27 = arith.constant 1.000000e+00 : f32
    %79 = vector.broadcast %cst_27 : f32 to vector<8x128xf32>
    %80 = arith.addf %79, %78 : vector<8x128xf32>
    %81 = arith.divf %79, %80 : vector<8x128xf32>
    %82 = math.tanh %76 : vector<8x128xf32>
    %83 = vector.extract_strided_slice %81 {offsets = [0, 0], sizes = [8, 32], strides = [1, 1]} : vector<8x128xf32> to vector<8x32xf32>
    %84 = vector.extract_strided_slice %81 {offsets = [0, 32], sizes = [8, 32], strides = [1, 1]} : vector<8x128xf32> to vector<8x32xf32>
    %85 = vector.extract_strided_slice %82 {offsets = [0, 64], sizes = [8, 32], strides = [1, 1]} : vector<8x128xf32> to vector<8x32xf32>
    %86 = vector.extract_strided_slice %81 {offsets = [0, 96], sizes = [8, 32], strides = [1, 1]} : vector<8x128xf32> to vector<8x32xf32>
    %87 = arith.mulf %84, %69 : vector<8x32xf32>
    %88 = arith.mulf %83, %85 : vector<8x32xf32>
    %89 = arith.addf %87, %88 : vector<8x32xf32>
    %90 = math.tanh %89 : vector<8x32xf32>
    %91 = arith.mulf %86, %90 : vector<8x32xf32>
    %c24 = arith.constant 24 : index
    %c0_28 = arith.constant 0 : index
    %92 = vector.load %arg17[%c24, %c0_28] : memref<64x32xf32, #tpu.memory_space<vmem>>, vector<8x32xf32>
    tpu.vector_store %arg17[%c24, %c0_28], %91 {strides = array<i32>} : memref<64x32xf32, #tpu.memory_space<vmem>>, vector<8x32xf32>,
    %93 = vector.extract_strided_slice %9 {offsets = [32, 0], sizes = [8, 128], strides = [1, 1]} : vector<64x128xf32> to vector<8x128xf32>
    %94 = arith.truncf %91 : vector<8x32xf32> to vector<8x32xbf16>
    %cst_29 = arith.constant dense<0.000000e+00> : vector<8x128xf32>
    %95 = tpu.matmul %94, %10, %cst_29 {dimension_numbers = #tpu.dot_dimension_numbers<[1], [0], [0], [1], [0, 0, 1, 1], [], []>} : vector<8x32xbf16>, vector<32x128xbf16>, vector<8x128xf32> -> vector<8x128xf32>
    %96 = arith.addf %93, %95 : vector<8x128xf32>
    %97 = arith.negf %96 : vector<8x128xf32>
    %98 = math.exp %97 : vector<8x128xf32>
    %cst_30 = arith.constant 1.000000e+00 : f32
    %99 = vector.broadcast %cst_30 : f32 to vector<8x128xf32>
    %100 = arith.addf %99, %98 : vector<8x128xf32>
    %101 = arith.divf %99, %100 : vector<8x128xf32>
    %102 = math.tanh %96 : vector<8x128xf32>
    %103 = vector.extract_strided_slice %101 {offsets = [0, 0], sizes = [8, 32], strides = [1, 1]} : vector<8x128xf32> to vector<8x32xf32>
    %104 = vector.extract_strided_slice %101 {offsets = [0, 32], sizes = [8, 32], strides = [1, 1]} : vector<8x128xf32> to vector<8x32xf32>
    %105 = vector.extract_strided_slice %102 {offsets = [0, 64], sizes = [8, 32], strides = [1, 1]} : vector<8x128xf32> to vector<8x32xf32>
    %106 = vector.extract_strided_slice %101 {offsets = [0, 96], sizes = [8, 32], strides = [1, 1]} : vector<8x128xf32> to vector<8x32xf32>
    %107 = arith.mulf %104, %89 : vector<8x32xf32>
    %108 = arith.mulf %103, %105 : vector<8x32xf32>
    %109 = arith.addf %107, %108 : vector<8x32xf32>
    %110 = math.tanh %109 : vector<8x32xf32>
    %111 = arith.mulf %106, %110 : vector<8x32xf32>
    %c32 = arith.constant 32 : index
    %c0_31 = arith.constant 0 : index
    %112 = vector.load %arg17[%c32, %c0_31] : memref<64x32xf32, #tpu.memory_space<vmem>>, vector<8x32xf32>
    tpu.vector_store %arg17[%c32, %c0_31], %111 {strides = array<i32>} : memref<64x32xf32, #tpu.memory_space<vmem>>, vector<8x32xf32>,
    %113 = vector.extract_strided_slice %9 {offsets = [40, 0], sizes = [8, 128], strides = [1, 1]} : vector<64x128xf32> to vector<8x128xf32>
    %114 = arith.truncf %111 : vector<8x32xf32> to vector<8x32xbf16>
    %cst_32 = arith.constant dense<0.000000e+00> : vector<8x128xf32>
    %115 = tpu.matmul %114, %10, %cst_32 {dimension_numbers = #tpu.dot_dimension_numbers<[1], [0], [0], [1], [0, 0, 1, 1], [], []>} : vector<8x32xbf16>, vector<32x128xbf16>, vector<8x128xf32> -> vector<8x128xf32>
    %116 = arith.addf %113, %115 : vector<8x128xf32>
    %117 = arith.negf %116 : vector<8x128xf32>
    %118 = math.exp %117 : vector<8x128xf32>
    %cst_33 = arith.constant 1.000000e+00 : f32
    %119 = vector.broadcast %cst_33 : f32 to vector<8x128xf32>
    %120 = arith.addf %119, %118 : vector<8x128xf32>
    %121 = arith.divf %119, %120 : vector<8x128xf32>
    %122 = math.tanh %116 : vector<8x128xf32>
    %123 = vector.extract_strided_slice %121 {offsets = [0, 0], sizes = [8, 32], strides = [1, 1]} : vector<8x128xf32> to vector<8x32xf32>
    %124 = vector.extract_strided_slice %121 {offsets = [0, 32], sizes = [8, 32], strides = [1, 1]} : vector<8x128xf32> to vector<8x32xf32>
    %125 = vector.extract_strided_slice %122 {offsets = [0, 64], sizes = [8, 32], strides = [1, 1]} : vector<8x128xf32> to vector<8x32xf32>
    %126 = vector.extract_strided_slice %121 {offsets = [0, 96], sizes = [8, 32], strides = [1, 1]} : vector<8x128xf32> to vector<8x32xf32>
    %127 = arith.mulf %124, %109 : vector<8x32xf32>
    %128 = arith.mulf %123, %125 : vector<8x32xf32>
    %129 = arith.addf %127, %128 : vector<8x32xf32>
    %130 = math.tanh %129 : vector<8x32xf32>
    %131 = arith.mulf %126, %130 : vector<8x32xf32>
    %c40 = arith.constant 40 : index
    %c0_34 = arith.constant 0 : index
    %132 = vector.load %arg17[%c40, %c0_34] : memref<64x32xf32, #tpu.memory_space<vmem>>, vector<8x32xf32>
    tpu.vector_store %arg17[%c40, %c0_34], %131 {strides = array<i32>} : memref<64x32xf32, #tpu.memory_space<vmem>>, vector<8x32xf32>,
    %133 = vector.extract_strided_slice %9 {offsets = [48, 0], sizes = [8, 128], strides = [1, 1]} : vector<64x128xf32> to vector<8x128xf32>
    %134 = arith.truncf %131 : vector<8x32xf32> to vector<8x32xbf16>
    %cst_35 = arith.constant dense<0.000000e+00> : vector<8x128xf32>
    %135 = tpu.matmul %134, %10, %cst_35 {dimension_numbers = #tpu.dot_dimension_numbers<[1], [0], [0], [1], [0, 0, 1, 1], [], []>} : vector<8x32xbf16>, vector<32x128xbf16>, vector<8x128xf32> -> vector<8x128xf32>
    %136 = arith.addf %133, %135 : vector<8x128xf32>
    %137 = arith.negf %136 : vector<8x128xf32>
    %138 = math.exp %137 : vector<8x128xf32>
    %cst_36 = arith.constant 1.000000e+00 : f32
    %139 = vector.broadcast %cst_36 : f32 to vector<8x128xf32>
    %140 = arith.addf %139, %138 : vector<8x128xf32>
    %141 = arith.divf %139, %140 : vector<8x128xf32>
    %142 = math.tanh %136 : vector<8x128xf32>
    %143 = vector.extract_strided_slice %141 {offsets = [0, 0], sizes = [8, 32], strides = [1, 1]} : vector<8x128xf32> to vector<8x32xf32>
    %144 = vector.extract_strided_slice %141 {offsets = [0, 32], sizes = [8, 32], strides = [1, 1]} : vector<8x128xf32> to vector<8x32xf32>
    %145 = vector.extract_strided_slice %142 {offsets = [0, 64], sizes = [8, 32], strides = [1, 1]} : vector<8x128xf32> to vector<8x32xf32>
    %146 = vector.extract_strided_slice %141 {offsets = [0, 96], sizes = [8, 32], strides = [1, 1]} : vector<8x128xf32> to vector<8x32xf32>
    %147 = arith.mulf %144, %129 : vector<8x32xf32>
    %148 = arith.mulf %143, %145 : vector<8x32xf32>
    %149 = arith.addf %147, %148 : vector<8x32xf32>
    %150 = math.tanh %149 : vector<8x32xf32>
    %151 = arith.mulf %146, %150 : vector<8x32xf32>
    %c48 = arith.constant 48 : index
    %c0_37 = arith.constant 0 : index
    %152 = vector.load %arg17[%c48, %c0_37] : memref<64x32xf32, #tpu.memory_space<vmem>>, vector<8x32xf32>
    tpu.vector_store %arg17[%c48, %c0_37], %151 {strides = array<i32>} : memref<64x32xf32, #tpu.memory_space<vmem>>, vector<8x32xf32>,
    %153 = vector.extract_strided_slice %9 {offsets = [56, 0], sizes = [8, 128], strides = [1, 1]} : vector<64x128xf32> to vector<8x128xf32>
    %154 = arith.truncf %151 : vector<8x32xf32> to vector<8x32xbf16>
    %cst_38 = arith.constant dense<0.000000e+00> : vector<8x128xf32>
    %155 = tpu.matmul %154, %10, %cst_38 {dimension_numbers = #tpu.dot_dimension_numbers<[1], [0], [0], [1], [0, 0, 1, 1], [], []>} : vector<8x32xbf16>, vector<32x128xbf16>, vector<8x128xf32> -> vector<8x128xf32>
    %156 = arith.addf %153, %155 : vector<8x128xf32>
    %157 = arith.negf %156 : vector<8x128xf32>
    %158 = math.exp %157 : vector<8x128xf32>
    %cst_39 = arith.constant 1.000000e+00 : f32
    %159 = vector.broadcast %cst_39 : f32 to vector<8x128xf32>
    %160 = arith.addf %159, %158 : vector<8x128xf32>
    %161 = arith.divf %159, %160 : vector<8x128xf32>
    %162 = math.tanh %156 : vector<8x128xf32>
    %163 = vector.extract_strided_slice %161 {offsets = [0, 0], sizes = [8, 32], strides = [1, 1]} : vector<8x128xf32> to vector<8x32xf32>
    %164 = vector.extract_strided_slice %161 {offsets = [0, 32], sizes = [8, 32], strides = [1, 1]} : vector<8x128xf32> to vector<8x32xf32>
    %165 = vector.extract_strided_slice %162 {offsets = [0, 64], sizes = [8, 32], strides = [1, 1]} : vector<8x128xf32> to vector<8x32xf32>
    %166 = vector.extract_strided_slice %161 {offsets = [0, 96], sizes = [8, 32], strides = [1, 1]} : vector<8x128xf32> to vector<8x32xf32>
    %167 = arith.mulf %164, %149 : vector<8x32xf32>
    %168 = arith.mulf %163, %165 : vector<8x32xf32>
    %169 = arith.addf %167, %168 : vector<8x32xf32>
    %170 = math.tanh %169 : vector<8x32xf32>
    %171 = arith.mulf %166, %170 : vector<8x32xf32>
    %c56 = arith.constant 56 : index
    %c0_40 = arith.constant 0 : index
    %172 = vector.load %arg17[%c56, %c0_40] : memref<64x32xf32, #tpu.memory_space<vmem>>, vector<8x32xf32>
    tpu.vector_store %arg17[%c56, %c0_40], %171 {strides = array<i32>} : memref<64x32xf32, #tpu.memory_space<vmem>>, vector<8x32xf32>,
    %c0_41 = arith.constant 0 : index
    %c0_42 = arith.constant 0 : index
    %173 = vector.load %arg15[%c0_41, %c0_42] : memref<8x32xf32, #tpu.memory_space<vmem>>, vector<8x32xf32>
    tpu.vector_store %arg15[%c0_41, %c0_42], %171 {strides = array<i32>} : memref<8x32xf32, #tpu.memory_space<vmem>>, vector<8x32xf32>,
    %c0_43 = arith.constant 0 : index
    %c0_44 = arith.constant 0 : index
    %174 = vector.load %arg16[%c0_43, %c0_44] : memref<8x32xf32, #tpu.memory_space<vmem>>, vector<8x32xf32>
    tpu.vector_store %arg16[%c0_43, %c0_44], %169 {strides = array<i32>} : memref<8x32xf32, #tpu.memory_space<vmem>>, vector<8x32xf32>,
    %c0_45 = arith.constant 0 : index
    %c0_46 = arith.constant 0 : index
    %175 = vector.load %arg17[%c0_45, %c0_46] : memref<64x32xf32, #tpu.memory_space<vmem>>, vector<64x32xf32>
    %176 = arith.truncf %175 : vector<64x32xf32> to vector<64x32xbf16>
    %c0_47 = arith.constant 0 : index
    %c0_48 = arith.constant 0 : index
    %177 = vector.load %arg9[%c0_47, %c0_48] : memref<32x32xbf16, #tpu.memory_space<vmem>>, vector<32x32xbf16>
    %cst_49 = arith.constant dense<0.000000e+00> : vector<64x32xf32>
    %178 = tpu.matmul %176, %177, %cst_49 {dimension_numbers = #tpu.dot_dimension_numbers<[1], [0], [0], [1], [0, 0, 1, 1], [], []>} : vector<64x32xbf16>, vector<32x32xbf16>, vector<64x32xf32> -> vector<64x32xf32>
    %c0_50 = arith.constant 0 : index
    %c0_51 = arith.constant 0 : index
    %179 = vector.load %arg2[%c0_50, %c0_51] : memref<64x8xbf16, #tpu.memory_space<vmem>>, vector<64x8xbf16>
    %c0_52 = arith.constant 0 : index
    %c0_53 = arith.constant 0 : index
    %180 = vector.load %arg10[%c0_52, %c0_53] : memref<8x32xbf16, #tpu.memory_space<vmem>>, vector<8x32xbf16>
    %cst_54 = arith.constant dense<0.000000e+00> : vector<64x32xf32>
    %181 = tpu.matmul %179, %180, %cst_54 {dimension_numbers = #tpu.dot_dimension_numbers<[1], [0], [0], [1], [0, 0, 1, 1], [], []>} : vector<64x8xbf16>, vector<8x32xbf16>, vector<64x32xf32> -> vector<64x32xf32>
    %182 = arith.addf %178, %181 : vector<64x32xf32>
    %c0_55 = arith.constant 0 : index
    %c0_56 = arith.constant 0 : index
    %183 = vector.load %arg11[%c0_55, %c0_56] : memref<1x32xf32, #tpu.memory_space<vmem>>, vector<1x32xf32>
    %184 = vector.broadcast %183 : vector<1x32xf32> to vector<64x32xf32>
    %185 = arith.addf %182, %184 : vector<64x32xf32>
    %cst_57 = arith.constant 0.00999999977 : f32
    %186 = vector.broadcast %cst_57 : f32 to vector<64x32xf32>
    %187 = arith.mulf %186, %185 : vector<64x32xf32>
    %188 = arith.maximumf %185, %187 : vector<64x32xf32>
    %189 = arith.truncf %188 : vector<64x32xf32> to vector<64x32xbf16>
    %c0_58 = arith.constant 0 : index
    %c0_59 = arith.constant 0 : index
    %190 = vector.load %arg12[%c0_58, %c0_59] : memref<32x128xbf16, #tpu.memory_space<vmem>>, vector<32x128xbf16>
    %cst_60 = arith.constant dense<0.000000e+00> : vector<64x128xf32>
    %191 = tpu.matmul %189, %190, %cst_60 {dimension_numbers = #tpu.dot_dimension_numbers<[1], [0], [0], [1], [0, 0, 1, 1], [], []>} : vector<64x32xbf16>, vector<32x128xbf16>, vector<64x128xf32> -> vector<64x128xf32>
    %c0_61 = arith.constant 0 : index
    %c0_62 = arith.constant 0 : index
    %192 = vector.load %arg13[%c0_61, %c0_62] : memref<1x128xf32, #tpu.memory_space<vmem>>, vector<1x128xf32>
    %193 = vector.broadcast %192 : vector<1x128xf32> to vector<64x128xf32>
    %194 = arith.addf %191, %193 : vector<64x128xf32>
    %c0_63 = arith.constant 0 : index
    %c0_64 = arith.constant 0 : index
    %195 = vector.load %arg14[%c0_63, %c0_64] : memref<64x128xf32, #tpu.memory_space<vmem>>, vector<64x128xf32>
    tpu.vector_store %arg14[%c0_63, %c0_64], %194 {strides = array<i32>} : memref<64x128xf32, #tpu.memory_space<vmem>>, vector<64x128xf32>,
    return
  }
}

</mosaic_0001>

<bundles_post_ra>
// kernel: tpu_custom_call.1
= control target key start
LH: loop header
LB: loop body
LE: loop exit
PB: predicated region body
PF: predicated region fallthrough
CT: control target
= control target key end

     0   :  { %s1666_s0 = inlined_call_operand.vmem [shape: bf16[64,16], index: 0, kind: input, shape index: {}]   ;;  %s1667_s1 = inlined_call_operand.vmem [shape: bf16[64,8], index: 1, kind: input, shape index: {}]   ;;  %s1668_s2 = inlined_call_operand.vmem [shape: bf16[64,8], index: 2, kind: input, shape index: {}]   ;;  %s1669_s3 = inlined_call_operand.vmem [shape: f32[8,32], index: 3, kind: input, shape index: {}]   ;;  %s1670_s4 = inlined_call_operand.vmem [shape: f32[8,32], index: 4, kind: input, shape index: {}]   ;;  %s1671_s5 = inlined_call_operand.vmem [shape: bf16[16,128], index: 5, kind: input, shape index: {}]   ;;  %s1672_s6 = inlined_call_operand.vmem [shape: bf16[8,128], index: 6, kind: input, shape index: {}]   ;;  %s1673_s7 = inlined_call_operand.vmem [shape: bf16[32,128], index: 7, kind: input, shape index: {}]   ;;  %s1674_s8 = inlined_call_operand.vmem [shape: f32[1,128], index: 8, kind: input, shape index: {}]   ;;  %s1675_s9 = inlined_call_operand.vmem [shape: bf16[32,32], index: 9, kind: input, shape index: {}]   ;;  %s1676_s10 = inlined_call_operand.vmem [shape: bf16[8,32], index: 10, kind: input, shape index: {}]   ;;  %s1677_s11 = inlined_call_operand.vmem [shape: f32[1,32], index: 11, kind: input, shape index: {}]   ;;  %s1678_s12 = inlined_call_operand.vmem [shape: bf16[32,128], index: 12, kind: input, shape index: {}]   ;;  %s1679_s13 = inlined_call_operand.vmem [shape: f32[1,128], index: 13, kind: input, shape index: {}]   ;;  %s1680_s14 = inlined_call_operand.hbm [shape: f32[64,128], index: 14, kind: output, shape index: {0}]   ;;  %s1681_s15 = inlined_call_operand.hbm [shape: f32[8,32], index: 15, kind: output, shape index: {1}]   ;;  %s1682_s16 = inlined_call_operand.hbm [shape: f32[8,32], index: 16, kind: output, shape index: {2}]  }
   0x1   :  { %1684 = sst [smem:[#allocation10_spill]] %s1666_s0 }
   0x2   :  { %22 = vsyncpa [#allocation4], 0  ;;  %v71_v0 = vld [vmem:[%s1672_s6] sm:$0xf]  ;;  %vm105_vm0 = vcmask 1043456   ;;  %v1424_v2 = vld [vmem:[%s1673_s7 + $0x8] sm:$0xff] }
   0x3   :  { %v1156_v1 = vld [vmem:[%s1671_s5] sm:$0xff]  ;;  %v107_v3 = vsel %vm105_vm0, %v71_v0, 0  ;;  %vm92_vm1 = vcmask 64512   ;;  %s1685_s6 = sld [smem:[#allocation10_spill]]  ;;  %vm164_vm2 = vcmask 130048   ;;  %247 = vmatpush.bf16.msra.mxu3 %v1424_v2  ;;  %377 = vmatpush.bf16.msra.mxu2 %v1424_v2 }
   0x4   :  { %v1157_v4 = vld [vmem:[%s1667_s1] sm:$0xff]  ;;  %116 = vmatpush.bf16.msra.mxu0 %v107_v3  ;;  %184 = vmatpush.bf16.msra.mxu1 %v1156_v1 }
   0x5   :  { %v1436_v6 = vld [vmem:[%s1673_s7] sm:$0xff] }
   0x6   :  { %v222_v7 = vld [vmem:[%s1669_s3] sm:$0xff] }
   0x9   :  { %v1152_v5 = vld [vmem:[%s1685_s6] sm:$0xff] }
   0xa   :  { %23 = vsyncpa [#allocation6], 0  ;;  %1056 = vmatmul.msk.bf16.vlgmr.msra.gmra.mxu0 %vm92_vm1, %v1157_v4  ;;  %1080 = vmatmul.msk.bf16.vlgmr.msra.gmra.mxu1 %vm164_vm2, %v1152_v5  ;;  %v224_v8 = vpack.c.bf16 %v222_v7, %v222_v7  ;;  %vm237_vm3 = vcmask 261120   ;;  %v1457_v12 = vld [vmem:[%s1674_s8] ss:$0 sm:$0xff]  ;;  %s1322_s19 = smov 64  }
   0xb   :  { %248 = vmatpush.bf16.msra.mxu3 %v1436_v6  ;;  %378 = vmatpush.bf16.msra.mxu2 %v1436_v6  ;;  %v223_v18 = vld [vmem:[%s1670_s4] sm:$0xff]  ;;  %s1323_s22 = smov 32   ;;  %s1324_s4 = smov 96  }
   0xc   :  { %s1011_s0 = sshll.u32 %s1681_s15, 4  ;;  %s1022_s3 = sshll.u32 %s1682_s16, 4  ;;  %s1012_s0 = int_to_ptr.hbm [resolvable:$true] %s1011_s0  ;;  %s1023_s3 = int_to_ptr.hbm [resolvable:$true] %s1022_s3 }
   0xd   :  { %s1327_s15 = smov [#allocation3]   ;;  %s997_s16 = sshll.u32 %s1680_s14, 4  ;;  %s998_s16 = int_to_ptr.hbm [resolvable:$true] %s997_s16 }
   0xe   :  { %1092 = vmatmul.msk.bf16.vlgmr.msra.gmra.mxu3 %vm237_vm3, %v224_v8  ;;  %v1158_v8 = vld [vmem:[%s1667_s1 + $0x8] sm:$0xff]  ;;  %s995_s7 = sshll.u32 %s1327_s15, 4  ;;  %s996_s7 = int_to_ptr.vmem [resolvable:$true] %s995_s7 }
   0xf   :  { %314 = vmatpush.bf16.msrb.mxu3 %v1424_v2  ;;  %503 = vmatpush.bf16.msrb.mxu2 %v1424_v2 }
  0x13   :  { %315 = vmatpush.bf16.msrb.mxu3 %v1436_v6  ;;  %504 = vmatpush.bf16.msrb.mxu2 %v1436_v6 }
  0x17   :  { %440 = vmatpush.bf16.msra.mxu3 %v1424_v2 }
  0x1a   :  { %1057 = vmatmul.msk.bf16.gmra.mxu0 %vm92_vm1, %v1158_v8 }
  0x1b   :  { %441 = vmatpush.bf16.msra.mxu3 %v1436_v6 }
  0x87   :  { %v118_v9 = vpop.f32.mrf.mxu0  ;;  %v186_v10 = vpop.f32.mrf.mxu1 }
  0x88   :  { %v187_v11 = vadd.f32 %v186_v10, %v118_v9  ;;  %v1153_v9 = vld [vmem:[%s1685_s6 + $0x8] sm:$0xff] }
  0x89   :  { %1081 = vmatmul.msk.bf16.gmra.mxu1 %vm164_vm2, %v1153_v9 }
  0x8a   :  { %v210_v13 = vadd.f32 %v1457_v12, %v187_v11 }
  0x8f   :  { %v120_v43 = vpop.f32.mrf.mxu0  ;;  %v188_v44 = vpop.f32.mrf.mxu1 }
  0x90   :  { %v189_v45 = vadd.f32 %v188_v44, %v120_v43 }
  0x91   :  { %v250_v14 = vpop.f32.mrf.mxu3 }
  0x92   :  { %v254_v15 = vadd.f32 %v250_v14, %v210_v13  ;;  %v211_v46 = vadd.f32 %v1457_v12, %v189_v45 }
  0x94   :  { %1182 = vtanh.f32 %v254_v15  ;;  %v1093_v19 = vmul.f32 -1.442695, %v254_v15 }
  0x96   :  { %1184 = vpow2.f32 %v1093_v19 }
  0x97   :  { %v123_v15 = vpop.f32.mrf.mxu0 }
  0x99   :  { %v252_v16 = vpop.f32.mrf.mxu3 }
  0x9a   :  { %v1183_v17 = vpop.eup %1182 }
  0x9b   :  { %281 = vrot.lane.b32.xlu0 %v1183_v17, %s1322_s19 }
  0x9c   :  { %v1185_v20 = vpop.eup %1184 }
  0x9d   :  { %v258_v21 = vadd.f32 1.0, %v1185_v20 }
  0x9f   :  { %1186 = vrcp.f32 %v258_v21  ;;  %v270_v27 = vand.u32 2147483648, %v258_v21  ;;  %vm264_vm5 = vweird.f32 %v258_v21  ;;  %v268_v28 = vand.u32 2147483647, %v258_v21 }
  0xa1   :  { %v271_v30 = vor.u32 1.1754944e-38, %v270_v27  ;;  %vm269_vm7 = vcmp.eq.f32.partialorder %v268_v28, 8.507059e+37 }
  0xa3   :  { %276 = vrot.lane.b32.xlu0 %v223_v18, %s1323_s22 }
  0xa5   :  { %v1187_v22 = vpop.eup %1186 }
  0xa6   :  { %v260_v23 = vmul.f32 %v1187_v22, %v258_v21  ;;  %vm265_vm4 = vweird.f32 %v1187_v22 }
  0xa7   :  { %vm266_vm6 = vmor %vm264_vm5, %vm265_vm4 }
  0xa8   :  { %v261_v24 = vsub.f32 1.0, %v260_v23 }
  0xaa   :  { %v262_v25 = vmul.f32 %v1187_v22, %v261_v24 }
  0xac   :  { %v263_v26 = vadd.f32 %v1187_v22, %v262_v25 }
  0xae   :  { %v267_v29 = vsel %vm266_vm6, %v1187_v22, %v263_v26 }
  0xaf   :  { %v272_v32 = vsel %vm269_vm7, %v271_v30, %v267_v29 }
 0x106   :  { %v191_v16 = vpop.f32.mrf.mxu1 }
 0x107   :  { %v192_v17 = vadd.f32 %v191_v16, %v123_v15 }
 0x109   :  { %v212_v18 = vadd.f32 %v1457_v12, %v192_v17 }
 0x10d   :  { %v282_v31 = vpop.permute.xlu0 %281 }
 0x10e   :  { %v284_v33 = vmul.f32 %v282_v31, %v272_v32 }
 0x110   :  { %286 = vrot.lane.b32.xlu1 %v284_v33, %s1323_s22 }
 0x115   :  { %v277_v34 = vpop.permute.xlu0 %276 }
 0x116   :  { %v279_v35 = vmul.f32 %v277_v34, %v272_v32 }
 0x182   :  { %v287_v36 = vpop.permute.xlu1 %286 }
 0x183   :  { %v289_v37 = vadd.f32 %v287_v36, %v279_v35 }
 0x185   :  { %1188 = vtanh.f32 %v289_v37 }
 0x18b   :  { %v1189_v38 = vpop.eup %1188 }
 0x18c   :  { %292 = vrot.lane.b32.xlu1 %v1189_v38, %s1322_s19 }
 0x1fe   :  { %v293_v39 = vpop.permute.xlu1 %292 }
 0x1ff   :  { %v1467_v40 = vmul.f32 %v293_v39, %v272_v32 }
 0x201   :  { %v301_v41 = vpack.c.bf16 %v1467_v40, %v1467_v40 }
 0x203   :  { %303 = vrot.lane.b32.xlu2 %v301_v41, %s1323_s22 }
 0x25d   :  { %v304_v42 = vpop.permute.xlu2 %303 }
 0x25e   :  { %1094 = vmatmul.msk.bf16.vlgmr.msrb.gmra.mxu3 %vm237_vm3, %v304_v42 }
 0x25f   :  { %566 = vmatpush.bf16.msrb.mxu3 %v1424_v2 }
 0x263   :  { %567 = vmatpush.bf16.msrb.mxu3 %v1436_v6 }
 0x2e1   :  { %v317_v47 = vpop.f32.mrf.mxu3 }
 0x2e2   :  { %v321_v48 = vadd.f32 %v317_v47, %v211_v46  ;;  %v125_v47 = vpop.f32.mrf.mxu0 }
 0x2e4   :  { %1190 = vtanh.f32 %v321_v48  ;;  %v1095_v51 = vmul.f32 -1.442695, %v321_v48  ;;  %v193_v48 = vpop.f32.mrf.mxu1 }
 0x2e6   :  { %1192 = vpow2.f32 %v1095_v51 }
 0x2e9   :  { %v319_v49 = vpop.f32.mrf.mxu3 }
 0x2ea   :  { %v1191_v50 = vpop.eup %1190  ;;  %v194_v49 = vadd.f32 %v193_v48, %v125_v47 }
 0x2eb   :  { %344 = vrot.lane.b32.xlu2 %v1191_v50, %s1322_s19 }
 0x2ec   :  { %v1193_v52 = vpop.eup %1192  ;;  %v213_v50 = vadd.f32 %v1457_v12, %v194_v49 }
 0x2ed   :  { %v325_v53 = vadd.f32 1.0, %v1193_v52 }
 0x2ef   :  { %1194 = vrcp.f32 %v325_v53  ;;  %v337_v59 = vand.u32 2147483648, %v325_v53  ;;  %vm331_vm9 = vweird.f32 %v325_v53  ;;  %v335_v60 = vand.u32 2147483647, %v325_v53 }
 0x2f1   :  { %v338_v62 = vor.u32 1.1754944e-38, %v337_v59  ;;  %vm336_vm11 = vcmp.eq.f32.partialorder %v335_v60, 8.507059e+37 }
 0x2f5   :  { %v1195_v54 = vpop.eup %1194 }
 0x2f6   :  { %v327_v55 = vmul.f32 %v1195_v54, %v325_v53  ;;  %vm332_vm8 = vweird.f32 %v1195_v54 }
 0x2f7   :  { %vm333_vm10 = vmor %vm331_vm9, %vm332_vm8 }
 0x2f8   :  { %v328_v56 = vsub.f32 1.0, %v327_v55 }
 0x2fa   :  { %v329_v57 = vmul.f32 %v1195_v54, %v328_v56 }
 0x2fc   :  { %v330_v58 = vadd.f32 %v1195_v54, %v329_v57 }
 0x2fe   :  { %v334_v61 = vsel %vm333_vm10, %v1195_v54, %v330_v58 }
 0x2ff   :  { %v339_v0 = vsel %vm336_vm11, %v338_v62, %v334_v61 }
 0x300   :  { %v342_v3 = vmul.f32 %v339_v0, %v289_v37 }
 0x345   :  { %v345_v63 = vpop.permute.xlu2 %344 }
 0x346   :  { %v347_v1 = vmul.f32 %v345_v63, %v339_v0 }
 0x348   :  { %349 = vrot.lane.b32.xlu0 %v347_v1, %s1323_s22 }
 0x3ba   :  { %v350_v4 = vpop.permute.xlu0 %349 }
 0x3bb   :  { %v352_v5 = vadd.f32 %v350_v4, %v342_v3 }
 0x3bd   :  { %1196 = vtanh.f32 %v352_v5 }
 0x3c3   :  { %v1197_v7 = vpop.eup %1196 }
 0x3c4   :  { %355 = vrot.lane.b32.xlu1 %v1197_v7, %s1322_s19 }
 0x436   :  { %v356_v10 = vpop.permute.xlu1 %355 }
 0x437   :  { %v1487_v11 = vmul.f32 %v356_v10, %v339_v0  ;;  %v1159_v10 = vld [vmem:[%s1667_s1 + $0x10] sm:$0xff] }
 0x438   :  { %1058 = vmatmul.msk.bf16.gmra.mxu0 %vm92_vm1, %v1159_v10 }
 0x439   :  { %v364_v13 = vpack.c.bf16 %v1487_v11, %v1487_v11 }
 0x43b   :  { %366 = vrot.lane.b32.xlu2 %v364_v13, %s1323_s22  ;;  %v1154_v13 = vld [vmem:[%s1685_s6 + $0x10] sm:$0xff] }
 0x43c   :  { %1082 = vmatmul.msk.bf16.gmra.mxu1 %vm164_vm2, %v1154_v13 }
 0x495   :  { %v367_v14 = vpop.permute.xlu2 %366 }
 0x496   :  { %1096 = vmatmul.msk.bf16.vlgmr.msra.gmra.mxu2 %vm237_vm3, %v367_v14 }
 0x497   :  { %629 = vmatpush.bf16.msra.mxu2 %v1424_v2 }
 0x49b   :  { %630 = vmatpush.bf16.msra.mxu2 %v1436_v6 }
 0x519   :  { %v380_v19 = vpop.f32.mrf.mxu2 }
 0x51a   :  { %v384_v20 = vadd.f32 %v380_v19, %v212_v18  ;;  %v128_v18 = vpop.f32.mrf.mxu0  ;;  %v196_v19 = vpop.f32.mrf.mxu1 }
 0x51c   :  { %1198 = vtanh.f32 %v384_v20  ;;  %v1097_v23 = vmul.f32 -1.442695, %v384_v20  ;;  %v197_v20 = vadd.f32 %v196_v19, %v128_v18  ;;  %v1155_v18 = vld [vmem:[%s1685_s6 + $0x18] sm:$0xff] }
 0x51d   :  { %1083 = vmatmul.msk.bf16.gmra.mxu1 %vm164_vm2, %v1155_v18 }
 0x51e   :  { %1200 = vpow2.f32 %v1097_v23 }
 0x521   :  { %v382_v21 = vpop.f32.mrf.mxu2 }
 0x522   :  { %v1199_v22 = vpop.eup %1198  ;;  %v214_v21 = vadd.f32 %v1457_v12, %v197_v20 }
 0x523   :  { %407 = vrot.lane.b32.xlu0 %v1199_v22, %s1322_s19 }
 0x524   :  { %v1201_v24 = vpop.eup %1200 }
 0x525   :  { %v388_v25 = vadd.f32 1.0, %v1201_v24 }
 0x527   :  { %1202 = vrcp.f32 %v388_v25  ;;  %v400_v31 = vand.u32 2147483648, %v388_v25  ;;  %vm394_vm13 = vweird.f32 %v388_v25  ;;  %v398_v32 = vand.u32 2147483647, %v388_v25 }
 0x529   :  { %v401_v34 = vor.u32 1.1754944e-38, %v400_v31  ;;  %vm399_vm15 = vcmp.eq.f32.partialorder %v398_v32, 8.507059e+37 }
 0x52d   :  { %v1203_v26 = vpop.eup %1202 }
 0x52e   :  { %v390_v27 = vmul.f32 %v1203_v26, %v388_v25  ;;  %vm395_vm12 = vweird.f32 %v1203_v26 }
 0x52f   :  { %vm396_vm14 = vmor %vm394_vm13, %vm395_vm12 }
 0x530   :  { %v391_v28 = vsub.f32 1.0, %v390_v27 }
 0x532   :  { %v392_v29 = vmul.f32 %v1203_v26, %v391_v28 }
 0x534   :  { %v393_v30 = vadd.f32 %v1203_v26, %v392_v29 }
 0x536   :  { %v397_v33 = vsel %vm396_vm14, %v1203_v26, %v393_v30 }
 0x537   :  { %v402_v36 = vsel %vm399_vm15, %v401_v34, %v397_v33 }
 0x538   :  { %v405_v38 = vmul.f32 %v402_v36, %v352_v5 }
 0x595   :  { %v408_v35 = vpop.permute.xlu0 %407 }
 0x596   :  { %v410_v37 = vmul.f32 %v408_v35, %v402_v36 }
 0x598   :  { %412 = vrot.lane.b32.xlu1 %v410_v37, %s1323_s22 }
 0x60a   :  { %v413_v39 = vpop.permute.xlu1 %412 }
 0x60b   :  { %v415_v41 = vadd.f32 %v413_v39, %v405_v38 }
 0x60d   :  { %1204 = vtanh.f32 %v415_v41 }
 0x613   :  { %v1205_v42 = vpop.eup %1204 }
 0x614   :  { %418 = vrot.lane.b32.xlu2 %v1205_v42, %s1322_s19 }
 0x66e   :  { %v419_v43 = vpop.permute.xlu2 %418 }
 0x66f   :  { %v1499_v44 = vmul.f32 %v419_v43, %v402_v36 }
 0x671   :  { %v427_v45 = vpack.c.bf16 %v1499_v44, %v1499_v44 }
 0x673   :  { %429 = vrot.lane.b32.xlu0 %v427_v45, %s1323_s22 }
 0x6e5   :  { %v430_v46 = vpop.permute.xlu0 %429 }
 0x6e6   :  { %1098 = vmatmul.msk.bf16.vlgmr.msra.gmra.mxu3 %vm237_vm3, %v430_v46 }
 0x6e7   :  { %692 = vmatpush.bf16.msra.mxu3 %v1424_v2 }
 0x6eb   :  { %693 = vmatpush.bf16.msra.mxu3 %v1436_v6 }
 0x769   :  { %v443_v51 = vpop.f32.mrf.mxu3 }
 0x76a   :  { %v447_v52 = vadd.f32 %v443_v51, %v213_v50  ;;  %v130_v51 = vpop.f32.mrf.mxu0 }
 0x76c   :  { %1206 = vtanh.f32 %v447_v52  ;;  %v1099_v55 = vmul.f32 -1.442695, %v447_v52  ;;  %v198_v52 = vpop.f32.mrf.mxu1 }
 0x76e   :  { %1208 = vpow2.f32 %v1099_v55 }
 0x771   :  { %v445_v53 = vpop.f32.mrf.mxu3 }
 0x772   :  { %v1207_v54 = vpop.eup %1206  ;;  %v199_v53 = vadd.f32 %v198_v52, %v130_v51 }
 0x773   :  { %470 = vrot.lane.b32.xlu1 %v1207_v54, %s1322_s19 }
 0x774   :  { %v1209_v56 = vpop.eup %1208  ;;  %v215_v54 = vadd.f32 %v1457_v12, %v199_v53 }
 0x775   :  { %v451_v57 = vadd.f32 1.0, %v1209_v56 }
 0x777   :  { %1210 = vrcp.f32 %v451_v57  ;;  %v463_v61 = vand.u32 2147483648, %v451_v57  ;;  %vm457_vm5 = vweird.f32 %v451_v57  ;;  %v461_v62 = vand.u32 2147483647, %v451_v57 }
 0x779   :  { %v464_v0 = vor.u32 1.1754944e-38, %v463_v61  ;;  %vm462_vm7 = vcmp.eq.f32.partialorder %v461_v62, 8.507059e+37 }
 0x77d   :  { %v1211_v2 = vpop.eup %1210 }
 0x77e   :  { %v453_v58 = vmul.f32 %v1211_v2, %v451_v57  ;;  %vm458_vm4 = vweird.f32 %v1211_v2 }
 0x77f   :  { %vm459_vm6 = vmor %vm457_vm5, %vm458_vm4 }
 0x780   :  { %v454_v6 = vsub.f32 1.0, %v453_v58 }
 0x782   :  { %v455_v59 = vmul.f32 %v1211_v2, %v454_v6 }
 0x784   :  { %v456_v60 = vadd.f32 %v1211_v2, %v455_v59 }
 0x786   :  { %v460_v63 = vsel %vm459_vm6, %v1211_v2, %v456_v60 }
 0x787   :  { %v465_v3 = vsel %vm462_vm7, %v464_v0, %v460_v63 }
 0x788   :  { %v468_v5 = vmul.f32 %v465_v3, %v415_v41 }
 0x7e5   :  { %v471_v1 = vpop.permute.xlu1 %470 }
 0x7e6   :  { %v473_v4 = vmul.f32 %v471_v1, %v465_v3 }
 0x7e8   :  { %475 = vrot.lane.b32.xlu2 %v473_v4, %s1323_s22 }
 0x842   :  { %v476_v7 = vpop.permute.xlu2 %475 }
 0x843   :  { %v478_v8 = vadd.f32 %v476_v7, %v468_v5 }
 0x845   :  { %1212 = vtanh.f32 %v478_v8 }
 0x84b   :  { %v1213_v9 = vpop.eup %1212 }
 0x84c   :  { %481 = vrot.lane.b32.xlu0 %v1213_v9, %s1322_s19 }
 0x8be   :  { %v482_v14 = vpop.permute.xlu0 %481 }
 0x8bf   :  { %v1519_v15 = vmul.f32 %v482_v14, %v465_v3 }
 0x8c1   :  { %v490_v16 = vpack.c.bf16 %v1519_v15, %v1519_v15 }
 0x8c3   :  { %492 = vrot.lane.b32.xlu1 %v490_v16, %s1323_s22 }
 0x935   :  { %v493_v17 = vpop.permute.xlu1 %492 }
 0x936   :  { %1100 = vmatmul.msk.bf16.vlgmr.msrb.gmra.mxu2 %vm237_vm3, %v493_v17  ;;  %v1160_v17 = vld [vmem:[%s1667_s1 + $0x18] sm:$0xff]  ;;  %s1326_s1 = smov [#allocation7]  }
 0x937   :  { %1059 = vmatmul.msk.bf16.gmra.mxu0 %vm92_vm1, %v1160_v17  ;;  %s1020_s6 = sshll.u32 %s1326_s1, 4  ;;  %s1021_s6 = int_to_ptr.vmem [resolvable:$true] %s1020_s6 }
 0x9b9   :  { %v506_v22 = vpop.f32.mrf.mxu2 }
 0x9ba   :  { %v510_v23 = vadd.f32 %v506_v22, %v214_v21 }
 0x9bc   :  { %1214 = vtanh.f32 %v510_v23  ;;  %v1101_v26 = vmul.f32 -1.442695, %v510_v23  ;;  %v133_v23 = vpop.f32.mrf.mxu0 }
 0x9be   :  { %1216 = vpow2.f32 %v1101_v26 }
 0x9c1   :  { %v508_v24 = vpop.f32.mrf.mxu2 }
 0x9c2   :  { %v1215_v25 = vpop.eup %1214  ;;  %v201_v24 = vpop.f32.mrf.mxu1 }
 0x9c3   :  { %533 = vrot.lane.b32.xlu2 %v1215_v25, %s1322_s19  ;;  %v202_v25 = vadd.f32 %v201_v24, %v133_v23 }
 0x9c4   :  { %v1217_v27 = vpop.eup %1216 }
 0x9c5   :  { %v514_v28 = vadd.f32 1.0, %v1217_v27  ;;  %v216_v26 = vadd.f32 %v1457_v12, %v202_v25 }
 0x9c7   :  { %1218 = vrcp.f32 %v514_v28  ;;  %v526_v34 = vand.u32 2147483648, %v514_v28  ;;  %vm520_vm9 = vweird.f32 %v514_v28  ;;  %v524_v35 = vand.u32 2147483647, %v514_v28 }
 0x9c9   :  { %v527_v37 = vor.u32 1.1754944e-38, %v526_v34  ;;  %vm525_vm11 = vcmp.eq.f32.partialorder %v524_v35, 8.507059e+37 }
 0x9cd   :  { %v1219_v29 = vpop.eup %1218 }
 0x9ce   :  { %v516_v30 = vmul.f32 %v1219_v29, %v514_v28  ;;  %vm521_vm8 = vweird.f32 %v1219_v29 }
 0x9cf   :  { %vm522_vm10 = vmor %vm520_vm9, %vm521_vm8 }
 0x9d0   :  { %v517_v31 = vsub.f32 1.0, %v516_v30 }
 0x9d2   :  { %v518_v32 = vmul.f32 %v1219_v29, %v517_v31 }
 0x9d4   :  { %v519_v33 = vadd.f32 %v1219_v29, %v518_v32 }
 0x9d6   :  { %v523_v36 = vsel %vm522_vm10, %v1219_v29, %v519_v33 }
 0x9d7   :  { %v528_v39 = vsel %vm525_vm11, %v527_v37, %v523_v36 }
 0x9d8   :  { %v531_v42 = vmul.f32 %v528_v39, %v478_v8 }
 0xa1d   :  { %v534_v38 = vpop.permute.xlu2 %533 }
 0xa1e   :  { %v536_v41 = vmul.f32 %v534_v38, %v528_v39 }
 0xa20   :  { %538 = vrot.lane.b32.xlu0 %v536_v41, %s1323_s22 }
 0xa92   :  { %v539_v43 = vpop.permute.xlu0 %538 }
 0xa93   :  { %v541_v45 = vadd.f32 %v539_v43, %v531_v42 }
 0xa95   :  { %1220 = vtanh.f32 %v541_v45 }
 0xa9b   :  { %v1221_v46 = vpop.eup %1220 }
 0xa9c   :  { %544 = vrot.lane.b32.xlu1 %v1221_v46, %s1322_s19 }
 0xb0e   :  { %v545_v47 = vpop.permute.xlu1 %544 }
 0xb0f   :  { %v1529_v48 = vmul.f32 %v545_v47, %v528_v39 }
 0xb11   :  { %v553_v49 = vpack.c.bf16 %v1529_v48, %v1529_v48 }
 0xb13   :  { %555 = vrot.lane.b32.xlu2 %v553_v49, %s1323_s22 }
 0xb6d   :  { %v556_v50 = vpop.permute.xlu2 %555 }
 0xb6e   :  { %1102 = vmatmul.msk.bf16.vlgmr.msrb.gmra.mxu3 %vm237_vm3, %v556_v50 }
 0xbf1   :  { %v569_v55 = vpop.f32.mrf.mxu3 }
 0xbf2   :  { %v573_v56 = vadd.f32 %v569_v55, %v215_v54 }
 0xbf4   :  { %1222 = vtanh.f32 %v573_v56  ;;  %v1103_v58 = vmul.f32 -1.442695, %v573_v56 }
 0xbf6   :  { %1224 = vpow2.f32 %v1103_v58 }
 0xbf9   :  { %v571_v57 = vpop.f32.mrf.mxu3 }
 0xbfa   :  { %v1223_v2 = vpop.eup %1222 }
 0xbfb   :  { %596 = vrot.lane.b32.xlu0 %v1223_v2, %s1322_s19 }
 0xbfc   :  { %v1225_v6 = vpop.eup %1224 }
 0xbfd   :  { %v577_v59 = vadd.f32 1.0, %v1225_v6  ;;  %v135_v6 = vpop.f32.mrf.mxu0 }
 0xbff   :  { %1226 = vrcp.f32 %v577_v59  ;;  %v589_v1 = vand.u32 2147483648, %v577_v59  ;;  %vm583_vm13 = vweird.f32 %v577_v59  ;;  %v587_v3 = vand.u32 2147483647, %v577_v59 }
 0xc01   :  { %v590_v5 = vor.u32 1.1754944e-38, %v589_v1  ;;  %vm588_vm15 = vcmp.eq.f32.partialorder %v587_v3, 8.507059e+37 }
 0xc05   :  { %v1227_v60 = vpop.eup %1226 }
 0xc06   :  { %v579_v61 = vmul.f32 %v1227_v60, %v577_v59  ;;  %vm584_vm12 = vweird.f32 %v1227_v60  ;;  %v203_v59 = vpop.f32.mrf.mxu1 }
 0xc07   :  { %vm585_vm14 = vmor %vm583_vm13, %vm584_vm12 }
 0xc08   :  { %v580_v62 = vsub.f32 1.0, %v579_v61 }
 0xc0a   :  { %v581_v63 = vmul.f32 %v1227_v60, %v580_v62 }
 0xc0c   :  { %v582_v0 = vadd.f32 %v1227_v60, %v581_v63 }
 0xc0e   :  { %v586_v4 = vsel %vm585_vm14, %v1227_v60, %v582_v0 }
 0xc0f   :  { %v591_v8 = vsel %vm588_vm15, %v590_v5, %v586_v4  ;;  %v772_v4 = vld [vmem:[%s1676_s10] sm:$0xf]  ;;  %s1329_s10 = smov 8  }
 0xc10   :  { %v594_v10 = vmul.f32 %v591_v8, %v541_v45 }
 0xc6d   :  { %v597_v7 = vpop.permute.xlu0 %596 }
 0xc6e   :  { %v599_v9 = vmul.f32 %v597_v7, %v591_v8 }
 0xc70   :  { %601 = vrot.lane.b32.xlu1 %v599_v9, %s1323_s22  ;;  %v1165_v9 = vld [vmem:[%s1668_s2] sm:$0xff] }
 0xce2   :  { %v602_v13 = vpop.permute.xlu1 %601 }
 0xce3   :  { %v604_v14 = vadd.f32 %v602_v13, %v594_v10 }
 0xce5   :  { %1228 = vtanh.f32 %v604_v14 }
 0xceb   :  { %v1229_v16 = vpop.eup %1228 }
 0xcec   :  { %607 = vrot.lane.b32.xlu2 %v1229_v16, %s1322_s19 }
 0xd46   :  { %v608_v19 = vpop.permute.xlu2 %607 }
 0xd47   :  { %v610_v20 = vmul.f32 %v608_v19, %v591_v8  ;;  %v1166_v19 = vld [vmem:[%s1668_s2 + $0x8] sm:$0xff] }
 0xd49   :  { %v616_v21 = vpack.c.bf16 %v610_v20, %v610_v20 }
 0xd4b   :  { %618 = vrot.lane.b32.xlu0 %v616_v21, %s1323_s22 }
 0xdbd   :  { %v619_v22 = vpop.permute.xlu0 %618 }
 0xdbe   :  { %1104 = vmatmul.msk.bf16.vlgmr.msra.gmra.mxu2 %vm237_vm3, %v619_v22 }
 0xe41   :  { %v632_v27 = vpop.f32.mrf.mxu2 }
 0xe42   :  { %v636_v28 = vadd.f32 %v632_v27, %v216_v26 }
 0xe44   :  { %1230 = vtanh.f32 %v636_v28  ;;  %v1105_v31 = vmul.f32 -1.442695, %v636_v28 }
 0xe46   :  { %1232 = vpow2.f32 %v1105_v31 }
 0xe49   :  { %v634_v29 = vpop.f32.mrf.mxu2 }
 0xe4a   :  { %v1231_v30 = vpop.eup %1230 }
 0xe4b   :  { %659 = vrot.lane.b32.xlu1 %v1231_v30, %s1322_s19 }
 0xe4c   :  { %v1233_v32 = vpop.eup %1232 }
 0xe4d   :  { %v640_v33 = vadd.f32 1.0, %v1233_v32 }
 0xe4f   :  { %1234 = vrcp.f32 %v640_v33  ;;  %v652_v39 = vand.u32 2147483648, %v640_v33  ;;  %vm646_vm4 = vweird.f32 %v640_v33  ;;  %v650_v41 = vand.u32 2147483647, %v640_v33 }
 0xe51   :  { %v653_v43 = vor.u32 1.1754944e-38, %v652_v39  ;;  %vm651_vm6 = vcmp.eq.f32.partialorder %v650_v41, 8.507059e+37 }
 0xe55   :  { %v1235_v34 = vpop.eup %1234 }
 0xe56   :  { %v642_v35 = vmul.f32 %v1235_v34, %v640_v33  ;;  %vm647_vm2 = vweird.f32 %v1235_v34 }
 0xe57   :  { %vm648_vm5 = vmor %vm646_vm4, %vm647_vm2 }
 0xe58   :  { %v643_v36 = vsub.f32 1.0, %v642_v35  ;;  %v1170_v35 = vld [vmem:[%s1678_s12 + $0x8] sm:$0xff] }
 0xe59   :  { %960 = vmatpush.bf16.msrb.mxu2 %v1170_v35 }
 0xe5a   :  { %v644_v37 = vmul.f32 %v1235_v34, %v643_v36 }
 0xe5c   :  { %v645_v38 = vadd.f32 %v1235_v34, %v644_v37  ;;  %v1169_v37 = vld [vmem:[%s1678_s12] sm:$0xff] }
 0xe5d   :  { %961 = vmatpush.bf16.msrb.mxu2 %v1169_v37 }
 0xe5e   :  { %v649_v42 = vsel %vm648_vm5, %v1235_v34, %v645_v38 }
 0xe5f   :  { %v654_v46 = vsel %vm651_vm6, %v653_v43, %v649_v42  ;;  %v1614_v43 = vld [vmem:[%s1677_s11] ss:$0 sm:$0xff] }
 0xe60   :  { %v657_v49 = vmul.f32 %v654_v46, %v604_v14 }
 0xebd   :  { %v660_v45 = vpop.permute.xlu1 %659 }
 0xebe   :  { %v662_v47 = vmul.f32 %v660_v45, %v654_v46 }
 0xec0   :  { %664 = vrot.lane.b32.xlu2 %v662_v47, %s1323_s22 }
 0xf1a   :  { %v665_v50 = vpop.permute.xlu2 %664 }
 0xf1b   :  { %v1552_v51 = vadd.f32 %v665_v50, %v657_v49 }
 0xf1d   :  { %1236 = vtanh.f32 %v1552_v51 }
 0xf23   :  { %v1237_v52 = vpop.eup %1236 }
 0xf24   :  { %670 = vrot.lane.b32.xlu0 %v1237_v52, %s1322_s19 }
 0xf96   :  { %v671_v53 = vpop.permute.xlu0 %670 }
 0xf97   :  { %v673_v54 = vmul.f32 %v671_v53, %v654_v46 }
 0xf99   :  { %v679_v55 = vpack.c.bf16 %v673_v54, %v673_v54 }
 0xf9b   :  { %681 = vrot.lane.b32.xlu1 %v679_v55, %s1323_s22 }
 0xfa3   :  { %297 = vrot.lane.b32.xlu1 %v1467_v40, %s1323_s22  ;;  %v204_v40 = vadd.f32 %v203_v59, %v135_v6 }
 0xfa5   :  { %v217_v60 = vadd.f32 %v1457_v12, %v204_v40  ;;  %v1164_v12 = vld [vmem:[%s1675_s9 + $0x8] sm:$0xff] }
 0xfa6   :  { %867 = vmatpush.bf16.msrb.mxu1 %v1164_v12 }
 0xfab   :  { %423 = vrot.lane.b32.xlu1 %v1499_v44, %s1323_s22 }
 0xfb3   :  { %612 = vrot.lane.b32.xlu1 %v610_v20, %s1323_s22 }
0x100d   :  { %v682_v56 = vpop.permute.xlu1 %681 }
0x100e   :  { %1106 = vmatmul.msk.bf16.vlgmr.msra.gmra.mxu3 %vm237_vm3, %v682_v56 }
0x1015   :  { %v298_v57 = vpop.permute.xlu1 %297 }
0x1016   :  { %300 = vst.msk [vmem:[#allocation2] sm:$0xff] %vm237_vm3, %v298_v57 }
0x101d   :  { %v424_v2 = vpop.permute.xlu1 %423  ;;  %v748_v25 = vld [vmem:[#allocation2] sm:$0xff] }
0x101e   :  { %426 = vst.msk [vmem:[#allocation2 + $0x10] sm:$0xff] %vm237_vm3, %v424_v2 }
0x1025   :  { %v613_v58 = vpop.permute.xlu1 %612  ;;  %v750_v30 = vld [vmem:[#allocation2 + $0x10] sm:$0xff] }
0x1026   :  { %615 = vst.msk [vmem:[#allocation2 + $0x28] sm:$0xff] %vm237_vm3, %v613_v58 }
0x1091   :  { %v695_v44 = vpop.f32.mrf.mxu3 }
0x1092   :  { %v699_v61 = vadd.f32 %v695_v44, %v217_v60 }
0x1094   :  { %1238 = vtanh.f32 %v699_v61  ;;  %v1107_v0 = vmul.f32 -1.442695, %v699_v61 }
0x1096   :  { %1240 = vpow2.f32 %v1107_v0 }
0x1099   :  { %v697_v62 = vpop.f32.mrf.mxu3 }
0x109a   :  { %v1239_v63 = vpop.eup %1238 }
0x109b   :  { %722 = vrot.lane.b32.xlu2 %v1239_v63, %s1322_s19  ;;  %v1167_v63 = vld [vmem:[%s1668_s2 + $0x10] sm:$0xff] }
0x109c   :  { %v1241_v1 = vpop.eup %1240 }
0x109d   :  { %v703_v3 = vadd.f32 1.0, %v1241_v1 }
0x109f   :  { %1242 = vrcp.f32 %v703_v3  ;;  %v715_v14 = vand.u32 2147483648, %v703_v3  ;;  %v713_v16 = vand.u32 2147483647, %v703_v3 }
0x10a1   :  { %v716_v18 = vor.u32 1.1754944e-38, %v715_v14  ;;  %vm714_vm9 = vcmp.eq.f32.partialorder %v713_v16, 8.507059e+37 }
0x10a3   :  { %360 = vrot.lane.b32.xlu2 %v1487_v11, %s1323_s22  ;;  %v806_v11 = vsel %vm105_vm0, %v772_v4, 0  ;;  %vm709_vm0 = vweird.f32 %v703_v3 }
0x10a4   :  { %815 = vmatpush.bf16.msrb.mxu0 %v806_v11 }
0x10a5   :  { %v1243_v5 = vpop.eup %1242 }
0x10a6   :  { %v705_v7 = vmul.f32 %v1243_v5, %v703_v3  ;;  %vm710_vm7 = vweird.f32 %v1243_v5 }
0x10a7   :  { %1124 = vmatmul.msk.bf16.vlgmr.msrb.gmra.mxu0 %vm92_vm1, %v1165_v9  ;;  %vm711_vm8 = vmor %vm709_vm0, %vm710_vm7 }
0x10a8   :  { %v706_v8 = vsub.f32 1.0, %v705_v7 }
0x10aa   :  { %v707_v10 = vmul.f32 %v1243_v5, %v706_v8 }
0x10ab   :  { %486 = vrot.lane.b32.xlu2 %v1519_v15, %s1323_s22  ;;  %v1163_v15 = vld [vmem:[%s1675_s9] sm:$0xff]  ;;  %s1328_s9 = smov 128  }
0x10ac   :  { %868 = vmatpush.bf16.msrb.mxu1 %v1163_v15  ;;  %v708_v13 = vadd.f32 %v1243_v5, %v707_v10  ;;  %v1634_v15 = vld [vmem:[%s1679_s13] ss:$0 sm:$0xff] }
0x10ae   :  { %v712_v17 = vsel %vm711_vm8, %v1243_v5, %v708_v13  ;;  %v753_v5 = vld [vmem:[#allocation2 + $0x28] sm:$0xff] }
0x10af   :  { %v1590_v21 = vsel %vm714_vm9, %v716_v18, %v712_v17  ;;  %v1168_v18 = vld [vmem:[%s1668_s2 + $0x18] sm:$0xff]  ;;  %s1325_s2 = smov [#allocation5]  }
0x10b0   :  { %v720_v32 = vmul.f32 %v1590_v21, %v1552_v51  ;;  %s1009_s13 = sshll.u32 %s1325_s2, 4  ;;  %s1010_s13 = int_to_ptr.vmem [resolvable:$true] %s1009_s13 }
0x10b3   :  { %675 = vrot.lane.b32.xlu2 %v673_v54, %s1323_s22 }
0x10b7   :  { %1125 = vmatmul.msk.bf16.gmra.mxu0 %vm92_vm1, %v1166_v19 }
0x10c7   :  { %1126 = vmatmul.msk.bf16.gmra.mxu0 %vm92_vm1, %v1167_v63 }
0x10d7   :  { %1127 = vmatmul.msk.bf16.gmra.mxu0 %vm92_vm1, %v1168_v18 }
0x10f5   :  { %v723_v20 = vpop.permute.xlu2 %722 }
0x10f6   :  { %v725_v22 = vmul.f32 %v723_v20, %v1590_v21 }
0x10f8   :  { %727 = vrot.lane.b32.xlu0 %v725_v22, %s1323_s22 }
0x10fd   :  { %v361_v23 = vpop.permute.xlu2 %360 }
0x10fe   :  { %363 = vst.msk [vmem:[#allocation2 + $0x8] sm:$0xff] %vm237_vm3, %v361_v23 }
0x1105   :  { %v487_v24 = vpop.permute.xlu2 %486  ;;  %v749_v26 = vld [vmem:[#allocation2 + $0x8] sm:$0xff] }
0x1106   :  { %489 = vst.msk [vmem:[#allocation2 + $0x18] sm:$0xff] %vm237_vm3, %v487_v24  ;;  %v756_v27 = vpack.c.bf16 %v749_v26, %v748_v25 }
0x1108   :  { %1136 = vmatmul.msk.bf16.vlgmr.msrb.gmra.mxu1 %vm237_vm3, %v756_v27 }
0x110d   :  { %v676_v28 = vpop.permute.xlu2 %675  ;;  %v751_v29 = vld [vmem:[#allocation2 + $0x18] sm:$0xff] }
0x110e   :  { %678 = vst.msk [vmem:[#allocation2 + $0x30] sm:$0xff] %vm237_vm3, %v676_v28  ;;  %v757_v31 = vpack.c.bf16 %v751_v29, %v750_v30 }
0x1115   :  { %v754_v20 = vld [vmem:[#allocation2 + $0x30] sm:$0xff] }
0x1118   :  { %1137 = vmatmul.msk.bf16.gmra.mxu1 %vm237_vm3, %v757_v31 }
0x1124   :  { %v817_v38 = vpop.f32.mrf.mxu0 }
0x112c   :  { %v819_v41 = vpop.f32.mrf.mxu0 }
0x1134   :  { %v822_v51 = vpop.f32.mrf.mxu0 }
0x113c   :  { %v824_v57 = vpop.f32.mrf.mxu0 }
0x1144   :  { %v827_v23 = vpop.f32.mrf.mxu0 }
0x114c   :  { %v829_v26 = vpop.f32.mrf.mxu0 }
0x116a   :  { %v728_v33 = vpop.permute.xlu0 %727 }
0x116b   :  { %v730_v34 = vadd.f32 %v728_v33, %v720_v32 }
0x116d   :  { %1244 = vtanh.f32 %v730_v34  ;;  %744 = vrot.lane.b32.xlu1 %v730_v34, %s1324_s4 }
0x1173   :  { %v1245_v36 = vpop.eup %1244 }
0x1174   :  { %733 = vrot.lane.b32.xlu0 %v1245_v36, %s1322_s19  ;;  %v832_v36 = vpop.f32.mrf.mxu0 }
0x117c   :  { %549 = vrot.lane.b32.xlu0 %v1529_v48, %s1323_s22 }
0x1185   :  { %v870_v39 = vpop.f32.mrf.mxu1 }
0x1186   :  { %v871_v42 = vadd.f32 %v870_v39, %v817_v38 }
0x1188   :  { %v894_v45 = vadd.f32 %v1614_v43, %v871_v42 }
0x118a   :  { %v902_v49 = vmul.f32 0.01, %v894_v45 }
0x118c   :  { %v910_v53 = vmax.f32 %v894_v45, %v902_v49 }
0x118d   :  { %v872_v46 = vpop.f32.mrf.mxu1 }
0x118e   :  { %v873_v47 = vadd.f32 %v872_v46, %v819_v41  ;;  %v834_v41 = vpop.f32.mrf.mxu0 }
0x1190   :  { %v895_v50 = vadd.f32 %v1614_v43, %v873_v47 }
0x1192   :  { %v903_v52 = vmul.f32 0.01, %v895_v50 }
0x1194   :  { %v911_v48 = vmax.f32 %v895_v50, %v903_v52 }
0x1195   :  { %v875_v54 = vpop.f32.mrf.mxu1 }
0x1196   :  { %v918_v55 = vpack.c.bf16 %v911_v48, %v910_v53  ;;  %v876_v56 = vadd.f32 %v875_v54, %v822_v51 }
0x1198   :  { %1148 = vmatmul.msk.bf16.vlgmr.msrb.gmra.mxu2 %vm237_vm3, %v918_v55  ;;  %v896_v2 = vadd.f32 %v1614_v43, %v876_v56 }
0x119a   :  { %v904_v59 = vmul.f32 0.01, %v896_v2 }
0x119c   :  { %v912_v44 = vmax.f32 %v896_v2, %v904_v59 }
0x119d   :  { %v877_v58 = vpop.f32.mrf.mxu1 }
0x119e   :  { %v878_v6 = vadd.f32 %v877_v58, %v824_v57 }
0x11a0   :  { %v897_v40 = vadd.f32 %v1614_v43, %v878_v6 }
0x11a2   :  { %v905_v60 = vmul.f32 0.01, %v897_v40 }
0x11a4   :  { %v913_v61 = vmax.f32 %v897_v40, %v905_v60 }
0x11a6   :  { %v919_v62 = vpack.c.bf16 %v913_v61, %v912_v44 }
0x11a8   :  { %1149 = vmatmul.msk.bf16.gmra.mxu2 %vm237_vm3, %v919_v62 }
0x11df   :  { %v745_v0 = vpop.permute.xlu1 %744 }
0x11e0   :  { %747 = vst.msk [vmem:[#allocation7] sm:$0xff] %vm237_vm3, %v745_v0 }
0x11e6   :  { %v734_v1 = vpop.permute.xlu0 %733 }
0x11e7   :  { %v736_v3 = vmul.f32 %v734_v1, %v1590_v21 }
0x11e9   :  { %738 = vrot.lane.b32.xlu0 %v736_v3, %s1323_s22 }
0x11ee   :  { %v550_v12 = vpop.permute.xlu0 %549 }
0x11ef   :  { %552 = vst.msk [vmem:[#allocation2 + $0x20] sm:$0xff] %vm237_vm3, %v550_v12 }
0x11f6   :  { %v752_v4 = vld [vmem:[#allocation2 + $0x20] sm:$0xff] }
0x11f7   :  { %v758_v11 = vpack.c.bf16 %v753_v5, %v752_v4 }
0x11f9   :  { %1138 = vmatmul.msk.bf16.gmra.mxu1 %vm237_vm3, %v758_v11 }
0x121b   :  { %v963_v7 = vpop.f32.mrf.mxu2 }
0x121c   :  { %v964_v8 = vadd.f32 %v1634_v15, %v963_v7 }
0x121e   :  { %983 = vst [vmem:[#allocation3] sm:$0xff] %v964_v8 }
0x1223   :  { %v965_v9 = vpop.f32.mrf.mxu2 }
0x1224   :  { %v966_v10 = vadd.f32 %v1634_v15, %v965_v9 }
0x1226   :  { %984 = vst [vmem:[#allocation3 + $0x8] sm:$0xff] %v966_v10 }
0x122b   :  { %v968_v13 = vpop.f32.mrf.mxu2 }
0x122c   :  { %v969_v14 = vadd.f32 %v1634_v15, %v968_v13 }
0x122e   :  { %985 = vst [vmem:[#allocation3 + $0x10] sm:$0xff] %v969_v14 }
0x1233   :  { %v970_v16 = vpop.f32.mrf.mxu2 }
0x1234   :  { %v971_v17 = vadd.f32 %v1634_v15, %v970_v16 }
0x1236   :  { %986 = vst [vmem:[#allocation3 + $0x18] sm:$0xff] %v971_v17 }
0x125b   :  { %v739_v19 = vpop.permute.xlu0 %738 }
0x125c   :  { %741 = vst.msk [vmem:[#allocation2 + $0x38] sm:$0xff] %vm237_vm3, %v739_v19 }
0x125d   :  { %742 = vst.msk [vmem:[#allocation5] sm:$0xff] %vm237_vm3, %v739_v19 }
0x125e   :  { %1014 = dma.vmem_to_hbm [thread:$0]  %s1010_s13, 128, %s1012_s0, [#allocation6]  }
0x125f   :  { %1025 = dma.vmem_to_hbm [thread:$0]  %s1021_s6, 128, %s1023_s3, [#allocation6]  }
0x1263   :  { %v755_v21 = vld [vmem:[#allocation2 + $0x38] sm:$0xff] }
0x1264   :  { %v759_v22 = vpack.c.bf16 %v755_v21, %v754_v20 }
0x1266   :  { %1139 = vmatmul.msk.bf16.gmra.mxu1 %vm237_vm3, %v759_v22 }
0x1276   :  { %v880_v24 = vpop.f32.mrf.mxu1 }
0x1277   :  { %v881_v25 = vadd.f32 %v880_v24, %v827_v23 }
0x1279   :  { %v898_v27 = vadd.f32 %v1614_v43, %v881_v25 }
0x127b   :  { %v906_v30 = vmul.f32 0.01, %v898_v27 }
0x127d   :  { %v914_v33 = vmax.f32 %v898_v27, %v906_v30 }
0x127e   :  { %v882_v28 = vpop.f32.mrf.mxu1 }
0x127f   :  { %v883_v29 = vadd.f32 %v882_v28, %v829_v26 }
0x1281   :  { %v899_v31 = vadd.f32 %v1614_v43, %v883_v29 }
0x1283   :  { %v907_v32 = vmul.f32 0.01, %v899_v31 }
0x1285   :  { %v915_v34 = vmax.f32 %v899_v31, %v907_v32 }
0x1287   :  { %v920_v35 = vpack.c.bf16 %v915_v34, %v914_v33 }
0x1289   :  { %1150 = vmatmul.msk.bf16.gmra.mxu2 %vm237_vm3, %v920_v35 }
0x12e3   :  { %v885_v37 = vpop.f32.mrf.mxu1 }
0x12e4   :  { %v886_v38 = vadd.f32 %v885_v37, %v832_v36 }
0x12e6   :  { %v900_v39 = vadd.f32 %v1614_v43, %v886_v38 }
0x12e8   :  { %v908_v46 = vmul.f32 0.01, %v900_v39 }
0x12ea   :  { %v916_v50 = vmax.f32 %v900_v39, %v908_v46 }
0x12eb   :  { %v887_v42 = vpop.f32.mrf.mxu1 }
0x12ec   :  { %v888_v45 = vadd.f32 %v887_v42, %v834_v41 }
0x12ee   :  { %v901_v47 = vadd.f32 %v1614_v43, %v888_v45 }
0x12f0   :  { %v909_v49 = vmul.f32 0.01, %v901_v47 }
0x12f2   :  { %v917_v51 = vmax.f32 %v901_v47, %v909_v49 }
0x12f4   :  { %v921_v52 = vpack.c.bf16 %v917_v51, %v916_v50 }
0x12f6   :  { %1151 = vmatmul.msk.bf16.gmra.mxu2 %vm237_vm3, %v921_v52 }
0x130c   :  { %v973_v43 = vpop.f32.mrf.mxu2 }
0x130d   :  { %v974_v53 = vadd.f32 %v1634_v15, %v973_v43 }
0x130f   :  { %987 = vst [vmem:[#allocation3 + $0x20] sm:$0xff] %v974_v53 }
0x1314   :  { %v975_v48 = vpop.f32.mrf.mxu2 }
0x1315   :  { %v976_v54 = vadd.f32 %v1634_v15, %v975_v48 }
0x1317   :  { %988 = vst [vmem:[#allocation3 + $0x28] sm:$0xff] %v976_v54 }
0x1379   :  { %v978_v55 = vpop.f32.mrf.mxu2 }
0x137a   :  { %v979_v56 = vadd.f32 %v1634_v15, %v978_v55 }
0x137c   :  { %989 = vst [vmem:[#allocation3 + $0x30] sm:$0xff] %v979_v56 }
0x1381   :  { %v980_v57 = vpop.f32.mrf.mxu2 }
0x1382   :  { %v981_v2 = vadd.f32 %v1634_v15, %v980_v57 }
0x1384   :  { %990 = vst [vmem:[#allocation3 + $0x38] sm:$0xff] %v981_v2 }
0x1385   :  { %1003 = dma.vmem_to_hbm [thread:$0]  %s996_s7, 1024, %s998_s16, [#allocation4], %s1328_s9, %s1328_s9, %s1329_s10  }
0x1386   :  { %1318 = dma.done.wait [#allocation4], 1024  }
0x1387   :  { %1319 = vsyncadd [#allocation4], 4294966272 }
0x1388   :  { %1320 = dma.done.wait [#allocation6], 256  }
0x1389   :  { %1321 = vsyncadd [#allocation6], 4294967040 }
0x138a   :  { %1038 = vsyncpa [#allocation4], 1 }
0x138b   :  { %1039 = vsyncpa [#allocation6], 1 }

</bundles_post_ra>
